<compile_context>
chip_gen: v7x
topology: tpu7x:2x2x1
jax: 0.10.0
libtpu: 0.0.40
codegen_flags: <defaults>
</compile_context>

<pallas_src>
import jax
import jax.numpy as jnp
from jax.experimental import pallas as pl
from jax.experimental.pallas import tpu as pltpu

LANE = 128


def _round_up(n, m):
    return ((n + m - 1) // m) * m


def _pad_to(a, rows, cols):
    r, c = a.shape
    return jnp.pad(a, ((0, rows - r), (0, cols - c)))


def mlp_kernel(x_ref, w1_ref, b1_ref, w2_ref, b2_ref, w3_ref, b3_ref, o_ref):
    # fc1 + relu  (bf16 operands -> f32 accumulation on the MXU)
    h1 = jnp.dot(x_ref[...], w1_ref[...], preferred_element_type=jnp.float32)
    h1 = jnp.maximum(h1 + b1_ref[...], 0.0)
    # fc2 + relu
    h2 = jnp.dot(h1.astype(w2_ref.dtype), w2_ref[...],
                 preferred_element_type=jnp.float32)
    h2 = jnp.maximum(h2 + b2_ref[...], 0.0)
    # out projection; output block is 128 lanes wide -> unmasked dense stores
    o = jnp.dot(h2.astype(w3_ref.dtype), w3_ref[...],
                preferred_element_type=jnp.float32)
    o_ref[...] = (o + b3_ref[...]).astype(o_ref.dtype)


def mlp_forward(x, w1, b1, w2, b2, w3, b3, *, batch_tile=512, use_bf16=True):
    B, IN = x.shape
    L1 = w1.shape[1]
    L2 = w2.shape[1]
    OUT = w3.shape[1]

    # Lane-pad all hidden/output feature dims to multiples of 128 (zeros).
    L1p = _round_up(L1, LANE)
    L2p = _round_up(L2, LANE)
    OUTp = _round_up(OUT, LANE)

    mxu_dtype = jnp.bfloat16 if use_bf16 else jnp.float32
    xk = x.astype(mxu_dtype)
    w1p = _pad_to(w1, IN, L1p).astype(mxu_dtype)
    w2p = _pad_to(w2, L1p, L2p).astype(mxu_dtype)
    w3p = _pad_to(w3, L2p, OUTp).astype(mxu_dtype)
    b1p = _pad_to(b1, 1, L1p).astype(jnp.float32)
    b2p = _pad_to(b2, 1, L2p).astype(jnp.float32)
    b3p = _pad_to(b3, 1, OUTp).astype(jnp.float32)

    bt = int(max(8, min(batch_tile, B)))
    grid = (pl.cdiv(B, bt),)

    out = pl.pallas_call(
        mlp_kernel,
        out_shape=jax.ShapeDtypeStruct((B, OUTp), jnp.float32),
        grid=grid,
        in_specs=[
            pl.BlockSpec((bt, IN), lambda i: (i, 0)),     # x batch tile
            pl.BlockSpec((IN, L1p), lambda i: (0, 0)),    # w1 (resident)
            pl.BlockSpec((1, L1p), lambda i: (0, 0)),     # b1
            pl.BlockSpec((L1p, L2p), lambda i: (0, 0)),   # w2
            pl.BlockSpec((1, L2p), lambda i: (0, 0)),     # b2
            pl.BlockSpec((L2p, OUTp), lambda i: (0, 0)),  # w3
            pl.BlockSpec((1, OUTp), lambda i: (0, 0)),    # b3
        ],
        out_specs=pl.BlockSpec((bt, OUTp), lambda i: (i, 0)),
        compiler_params=pltpu.CompilerParams(
            dimension_semantics=("parallel",)),
    )(xk, w1p, b1p, w2p, b2p, w3p, b3p)

    return out[:, :OUT]


def init_params(key, input_features=64, layer1=32, layer2=16, out_features=10):
    # Deterministic uniform init (PyTorch Linear default scale).
    ks = jax.random.split(key, 6)

    def lin(kw, kb, fan_in, fan_out):
        bound = 1.0 / jnp.sqrt(fan_in)
        w = jax.random.uniform(kw, (fan_in, fan_out), jnp.float32, -bound, bound)
        b = jax.random.uniform(kb, (1, fan_out), jnp.float32, -bound, bound)
        return w, b

    w1, b1 = lin(ks[0], ks[1], input_features, layer1)
    w2, b2 = lin(ks[2], ks[3], layer1, layer2)
    w3, b3 = lin(ks[4], ks[5], layer2, out_features)
    return w1, b1, w2, b2, w3, b3


if __name__ == "__main__":
    key = jax.random.PRNGKey(0)
    k_x, k_p = jax.random.split(key)

    B, IN = 256, 64
    x = jax.random.normal(k_x, (B, IN), jnp.float32)
    w1, b1, w2, b2, w3, b3 = init_params(k_p, input_features=IN,
                                         layer1=32, layer2=16, out_features=10)

    # batch_tile=128 -> grid=(2,): exercises the tiled path / both v7x TCs.
    out = mlp_forward(x, w1, b1, w2, b2, w3, b3, batch_tile=128, use_bf16=True)
    out = jax.block_until_ready(out)

    # Pure-JAX reference with the same bf16 input rounding + f32 accumulation.
    def bf(a):
        return a.astype(jnp.bfloat16).astype(jnp.float32)

    h1 = jnp.maximum(bf(x) @ bf(w1) + b1, 0.0)
    h2 = jnp.maximum(bf(h1) @ bf(w2) + b2, 0.0)
    ref = bf(h2) @ bf(w3) + b3

    assert out.shape == (B, 10)
    assert jnp.allclose(out, ref, atol=2e-2, rtol=2e-2)

    print("KERNEL_OK")
</pallas_src>

<mosaic_0001>
module attributes {stable_mosaic.version = 11 : i64} {
  func.func @mlp_kernel(%arg0: i32, %arg1: memref<128x64xbf16, #tpu.memory_space<vmem>>, %arg2: memref<64x128xbf16, #tpu.memory_space<vmem>>, %arg3: memref<1x128xf32, #tpu.memory_space<vmem>>, %arg4: memref<128x128xbf16, #tpu.memory_space<vmem>>, %arg5: memref<1x128xf32, #tpu.memory_space<vmem>>, %arg6: memref<128x128xbf16, #tpu.memory_space<vmem>>, %arg7: memref<1x128xf32, #tpu.memory_space<vmem>>, %arg8: memref<128x128xf32, #tpu.memory_space<vmem>>) attributes {dimension_semantics = [#tpu.dimension_semantics<parallel>], iteration_bounds = array<i64: 2>, scalar_prefetch = 0 : i64, scratch_operands = 0 : i64, tpu.core_type = #tpu.core_type<tc>, window_params = [{transform_indices = @transform_0, window_bounds = array<i64: 128, 64>}, {pipeline_mode = #tpu.pipeline_mode<synchronous>, transform_indices = @transform_1, window_bounds = array<i64: 64, 128>}, {pipeline_mode = #tpu.pipeline_mode<synchronous>, transform_indices = @transform_2, window_bounds = array<i64: 1, 128>}, {pipeline_mode = #tpu.pipeline_mode<synchronous>, transform_indices = @transform_3, window_bounds = array<i64: 128, 128>}, {pipeline_mode = #tpu.pipeline_mode<synchronous>, transform_indices = @transform_4, window_bounds = array<i64: 1, 128>}, {pipeline_mode = #tpu.pipeline_mode<synchronous>, transform_indices = @transform_5, window_bounds = array<i64: 128, 128>}, {pipeline_mode = #tpu.pipeline_mode<synchronous>, transform_indices = @transform_6, window_bounds = array<i64: 1, 128>}, {transform_indices = @transform_7, window_bounds = array<i64: 128, 128>}]} {
    %c0 = arith.constant 0 : index
    %c0_0 = arith.constant 0 : index
    %0 = vector.load %arg1[%c0, %c0_0] : memref<128x64xbf16, #tpu.memory_space<vmem>>, vector<128x64xbf16>
    %c0_1 = arith.constant 0 : index
    %c0_2 = arith.constant 0 : index
    %1 = vector.load %arg2[%c0_1, %c0_2] : memref<64x128xbf16, #tpu.memory_space<vmem>>, vector<64x128xbf16>
    %cst = arith.constant dense<0.000000e+00> : vector<128x128xf32>
    %2 = tpu.matmul %0, %1, %cst {dimension_numbers = #tpu.dot_dimension_numbers<[1], [0], [0], [1], [0, 0, 1, 1], [], []>} : vector<128x64xbf16>, vector<64x128xbf16>, vector<128x128xf32> -> vector<128x128xf32>
    %c0_3 = arith.constant 0 : index
    %c0_4 = arith.constant 0 : index
    %3 = vector.load %arg3[%c0_3, %c0_4] : memref<1x128xf32, #tpu.memory_space<vmem>>, vector<1x128xf32>
    %4 = vector.broadcast %3 : vector<1x128xf32> to vector<128x128xf32>
    %5 = arith.addf %2, %4 : vector<128x128xf32>
    %cst_5 = arith.constant 0.000000e+00 : f32
    %6 = vector.broadcast %cst_5 : f32 to vector<128x128xf32>
    %7 = arith.maximumf %5, %6 : vector<128x128xf32>
    %8 = arith.truncf %7 : vector<128x128xf32> to vector<128x128xbf16>
    %c0_6 = arith.constant 0 : index
    %c0_7 = arith.constant 0 : index
    %9 = vector.load %arg4[%c0_6, %c0_7] : memref<128x128xbf16, #tpu.memory_space<vmem>>, vector<128x128xbf16>
    %cst_8 = arith.constant dense<0.000000e+00> : vector<128x128xf32>
    %10 = tpu.matmul %8, %9, %cst_8 {dimension_numbers = #tpu.dot_dimension_numbers<[1], [0], [0], [1], [0, 0, 1, 1], [], []>} : vector<128x128xbf16>, vector<128x128xbf16>, vector<128x128xf32> -> vector<128x128xf32>
    %c0_9 = arith.constant 0 : index
    %c0_10 = arith.constant 0 : index
    %11 = vector.load %arg5[%c0_9, %c0_10] : memref<1x128xf32, #tpu.memory_space<vmem>>, vector<1x128xf32>
    %12 = vector.broadcast %11 : vector<1x128xf32> to vector<128x128xf32>
    %13 = arith.addf %10, %12 : vector<128x128xf32>
    %cst_11 = arith.constant 0.000000e+00 : f32
    %14 = vector.broadcast %cst_11 : f32 to vector<128x128xf32>
    %15 = arith.maximumf %13, %14 : vector<128x128xf32>
    %16 = arith.truncf %15 : vector<128x128xf32> to vector<128x128xbf16>
    %c0_12 = arith.constant 0 : index
    %c0_13 = arith.constant 0 : index
    %17 = vector.load %arg6[%c0_12, %c0_13] : memref<128x128xbf16, #tpu.memory_space<vmem>>, vector<128x128xbf16>
    %cst_14 = arith.constant dense<0.000000e+00> : vector<128x128xf32>
    %18 = tpu.matmul %16, %17, %cst_14 {dimension_numbers = #tpu.dot_dimension_numbers<[1], [0], [0], [1], [0, 0, 1, 1], [], []>} : vector<128x128xbf16>, vector<128x128xbf16>, vector<128x128xf32> -> vector<128x128xf32>
    %c0_15 = arith.constant 0 : index
    %c0_16 = arith.constant 0 : index
    %19 = vector.load %arg7[%c0_15, %c0_16] : memref<1x128xf32, #tpu.memory_space<vmem>>, vector<1x128xf32>
    %20 = vector.broadcast %19 : vector<1x128xf32> to vector<128x128xf32>
    %21 = arith.addf %18, %20 : vector<128x128xf32>
    %c0_17 = arith.constant 0 : index
    %c0_18 = arith.constant 0 : index
    %22 = vector.load %arg8[%c0_17, %c0_18] : memref<128x128xf32, #tpu.memory_space<vmem>>, vector<128x128xf32>
    tpu.vector_store %arg8[%c0_17, %c0_18], %21 {strides = array<i32>} : memref<128x128xf32, #tpu.memory_space<vmem>>, vector<128x128xf32>,
    return
  }
  func.func @transform_0(%arg0: i32) -> (i32, i32) {
    %c0_i32 = arith.constant 0 : i32
    %c0_i32_0 = arith.constant 0 : i32
    return %arg0, %c0_i32 : i32, i32
  }
  func.func @transform_1(%arg0: i32) -> (i32, i32) {
    %c0_i32 = arith.constant 0 : i32
    %c0_i32_0 = arith.constant 0 : i32
    %c0_i32_1 = arith.constant 0 : i32
    return %c0_i32, %c0_i32_0 : i32, i32
  }
  func.func @transform_2(%arg0: i32) -> (i32, i32) {
    %c0_i32 = arith.constant 0 : i32
    %c0_i32_0 = arith.constant 0 : i32
    %c0_i32_1 = arith.constant 0 : i32
    return %c0_i32, %c0_i32_0 : i32, i32
  }
  func.func @transform_3(%arg0: i32) -> (i32, i32) {
    %c0_i32 = arith.constant 0 : i32
    %c0_i32_0 = arith.constant 0 : i32
    %c0_i32_1 = arith.constant 0 : i32
    return %c0_i32, %c0_i32_0 : i32, i32
  }
  func.func @transform_4(%arg0: i32) -> (i32, i32) {
    %c0_i32 = arith.constant 0 : i32
    %c0_i32_0 = arith.constant 0 : i32
    %c0_i32_1 = arith.constant 0 : i32
    return %c0_i32, %c0_i32_0 : i32, i32
  }
  func.func @transform_5(%arg0: i32) -> (i32, i32) {
    %c0_i32 = arith.constant 0 : i32
    %c0_i32_0 = arith.constant 0 : i32
    %c0_i32_1 = arith.constant 0 : i32
    return %c0_i32, %c0_i32_0 : i32, i32
  }
  func.func @transform_6(%arg0: i32) -> (i32, i32) {
    %c0_i32 = arith.constant 0 : i32
    %c0_i32_0 = arith.constant 0 : i32
    %c0_i32_1 = arith.constant 0 : i32
    return %c0_i32, %c0_i32_0 : i32, i32
  }
  func.func @transform_7(%arg0: i32) -> (i32, i32) {
    %c0_i32 = arith.constant 0 : i32
    %c0_i32_0 = arith.constant 0 : i32
    return %arg0, %c0_i32 : i32, i32
  }
}

</mosaic_0001>

<bundles_post_ra>
// kernel: tpu_custom_call.1
= control target key start
LH: loop header
LB: loop body
LE: loop exit
PB: predicated region body
PF: predicated region fallthrough
CT: control target
= control target key end

     0   :  { %12 = vsyncpa [#allocation3], 0  ;;  %s1598_s0 = inlined_call_operand.vmem [shape: bf16[256,64], index: 0, kind: input, shape index: {}]   ;;  %s1599_s1 = inlined_call_operand.vmem [shape: bf16[64,128], index: 1, kind: input, shape index: {}]   ;;  %s1600_s2 = inlined_call_operand.vmem [shape: f32[1,128], index: 2, kind: input, shape index: {}]   ;;  %s1601_s3 = inlined_call_operand.vmem [shape: bf16[128,128], index: 3, kind: input, shape index: {}]   ;;  %s1602_s4 = inlined_call_operand.vmem [shape: f32[1,128], index: 4, kind: input, shape index: {}]   ;;  %s1603_s5 = inlined_call_operand.vmem [shape: bf16[128,128], index: 5, kind: input, shape index: {}]   ;;  %s1604_s6 = inlined_call_operand.vmem [shape: f32[1,128], index: 6, kind: input, shape index: {}]   ;;  %s1605_s7 = inlined_call_operand.hbm [shape: f32[256,128], index: 7, kind: output, shape index: {}]  }
   0x1   :  { %14 = vsyncpa [#allocation3 + $0x1], 0  ;;  %s1350_s24 = smov 0   ;;  %s1352_s25 = smov 0  }
   0x2   :  { %s1354_s26 = smov 0   ;;  %s1356_s27 = smov 0  }
   0x3 LB: > { %s1371_s28 = sadd.s32 4294967295, %s1305_s27   ;;  %s974_s29 = sadd.s32 4294967294, %s1305_s27   ;;  %s1305_s27 = sphi %s1356_s27, %s1611_s27   ;;  %s1301_s26 = sphi %s1354_s26, %s1610_s26   ;;  %s1297_s25 = sphi %s1352_s25, %s1609_s25   ;;  %s1293_s24 = sphi %s1350_s24, %s1608_s24  }
   0x4   : > { %s1375_s30 = sadd.s32 1, %s1305_s27   ;;  %s179_s8 = sadd.s32 1, %s1301_s26 }
   0x5   : > { %s176_s9 = ssub.s32 %s1305_s27, %s1375_s30  ;;  %p189_p0 = scmp.ne.s32.totalorder %s1301_s26, %s1297_s25 }
   0x6   : > { %p177_p1 = scmp.eq.s32.totalorder %s176_s9, 0  ;;  %p190_p2 = scmp.eq.s32.totalorder %s1371_s28, 1 }
   0x7   : > { %p195_p3 = scmp.ne.s32.totalorder %s1297_s25, %s1293_s24  ;;  %p196_p4 = scmp.eq.s32.totalorder %s974_s29, 1 }
   0x8   : > { %s1386_s10 = scalar_select %p177_p1, %s1301_s26, %s179_s8  }
   0x9   : > { %p1388_p5 = por %p190_p2, %p189_p0  ;;  %p1392_p6 = por %p196_p4, %p195_p3 }
   0xa   : > { %p977_p7 = scmp.ge.s32.totalorder %s1305_s27, 1  ;;  %p241_p8 = scmp.lt.s32.totalorder %s1305_s27, 3 }
   0xc   : > { %p242_p9 = pnand %p977_p7, %p241_p8 }
   0xd   : > { %v1215_v0 = vld [vmem:[%s1599_s1] sm:$0xff] (!%p242_p9)   ;;  %s979_s15 = sshll.u32 (!%p242_p9), %s1371_s28, 4  ;;  %v1216_v1 = vld [vmem:[%s1599_s1 + $0x8] sm:$0xff] (!%p242_p9)   ;;  %v1217_v2 = vld [vmem:[%s1599_s1 + $0x10] sm:$0xff] (!%p242_p9)   ;;  %vm376_vm0 = vcmask (!%p242_p9), 523264   ;;  %s270_s20 = sand.u32 (!%p242_p9), 1, %s1297_s25  }
   0xe   : > { %245 = sbr.rel (%p242_p9) target bundleno = 730 (0x2da), region = 48  ;;  %p274_p10 = scmp.lt.s32.totalorder (!%p242_p9), %s979_s15, 31  ;;  %1070 = vmatprep.subr.bf16.mxu0 (!%p242_p9), %v1215_v0  ;;  %v1227_v3 = vld [vmem:[%s1601_s3] sm:$0xff] (!%p242_p9)   ;;  %v1228_v4 = vld [vmem:[%s1601_s3 + $0x8] sm:$0xff] (!%p242_p9)   ;;  %v1218_v5 = vld [vmem:[%s1599_s1 + $0x18] sm:$0xff] (!%p242_p9)  }
   0xf   : > { %1071 = vmatpush3.bf16.msra.mxu0 (!%p242_p9), %v1215_v0  ;;  %1094 = vmatprep.subr.bf16.mxu1 (!%p242_p9), %v1227_v3  ;;  %v1229_v7 = vld [vmem:[%s1601_s3 + $0x10] sm:$0xff] (!%p242_p9)   ;;  %v1230_v10 = vld [vmem:[%s1601_s3 + $0x18] sm:$0xff] (!%p242_p9)   ;;  %v1231_v11 = vld [vmem:[%s1601_s3 + $0x20] sm:$0xff] (!%p242_p9)   ;;  %s978_s21 = sshll.u32 (!%p242_p9), %s270_s20, 7  ;;  %s1025_s8 = sshll.u32 (!%p242_p9), %s1371_s28, 11 }
  0x10   : > { %1072 = vmatprep.subr.bf16.mxu0 (!%p242_p9), %v1216_v1  ;;  %1095 = vmatpush3.bf16.msra.mxu1 (!%p242_p9), %v1227_v3  ;;  %v1232_v12 = vld [vmem:[%s1601_s3 + $0x28] sm:$0xff] (!%p242_p9)   ;;  %v1233_v18 = vld [vmem:[%s1601_s3 + $0x30] sm:$0xff] (!%p242_p9)   ;;  %v1234_v19 = vld [vmem:[%s1601_s3 + $0x38] sm:$0xff] (!%p242_p9)   ;;  %s1528_s29 = scalar_lea.vmem (!%p242_p9), [#allocation2], %s978_s21  ;;  %s1557_s28 = scalar_lea.sflag (!%p242_p9), [#allocation3], %s270_s20 }
  0x11   : > { %1096 = vmatprep.subr.bf16.mxu1 (!%p242_p9), %v1228_v4  ;;  %v1235_v20 = vld [vmem:[%s1603_s5] sm:$0xff] (!%p242_p9)   ;;  %v1236_v21 = vld [vmem:[%s1603_s5 + $0x8] sm:$0xff] (!%p242_p9)   ;;  %v1237_v22 = vld [vmem:[%s1603_s5 + $0x10] sm:$0xff] (!%p242_p9)   ;;  %s912_s9 = sshll.u32 (!%p242_p9), %s1528_s29, 4  ;;  %s1550_s9 = int_to_ptr.vmem [resolvable:$true] %s912_s9 }
  0x12   : > { %v1468_v23 = vld [vmem:[%s1603_s5 + $0x18] sm:$0xff] (!%p242_p9)   ;;  %v1474_v24 = vld [vmem:[%s1603_s5 + $0x20] sm:$0xff] (!%p242_p9)   ;;  %v1481_v25 = vld [vmem:[%s1603_s5 + $0x28] sm:$0xff] (!%p242_p9)   ;;  %s1243_s17 = scalar_lea.vmem (!%p242_p9), %s1550_s9, 2048 }
  0x13   : > { %1073 = vmatpush3.bf16.msra.mxu0 (!%p242_p9), %v1216_v1  ;;  %v1489_v26 = vld [vmem:[%s1600_s2] ss:$0 sm:$0xff] (!%p242_p9)  ;;  %p1244_p11 = scmp.ne.s32.totalorder (!%p242_p9), %s1550_s9, %s1243_s17 }
  0x14   : > { %1074 = vmatprep.subr.bf16.mxu0 (!%p242_p9), %v1217_v2  ;;  %1097 = vmatpush3.bf16.msra.mxu1 (!%p242_p9), %v1228_v4 }
  0x15   : > { %s1613_s15 = smov (!%p274_p10, %s979_s15), 31  ;;  %1098 = vmatprep.subr.bf16.mxu1 %v1229_v7  ;;  %p1245_p12 = pnand %p1244_p11, %p1388_p5 }
  0x16   : > { %s980_s22 = sshll.u32 %s1613_s15, 2  ;;  %s1548_s15 = scalar_lea.hbm %s1605_s7, %s1025_s8 }
  0x17   : > { %s1420_s16 = scalar_lea.vmem %s1598_s0, %s980_s22  ;;  %1075 = vmatpush3.bf16.msra.mxu0 %v1217_v2  ;;  %p1246_p13 = pneg %p1245_p12 }
  0x18   : > { %v1219_v6 = vld [vmem:[%s1420_s16] sm:$0xff]   ;;  %1076 = vmatprep.subr.bf16.mxu0 %v1218_v5  ;;  %v1220_v8 = vld [vmem:[%s1420_s16 + $0x8] sm:$0xff]   ;;  %v1221_v9 = vld [vmem:[%s1420_s16 + $0x10] sm:$0xff]   ;;  %1099 = vmatpush3.bf16.msra.mxu1 %v1229_v7 }
  0x19   : > { %1078 = vmatprep.mubr.msk.bf16.mxu0 %vm376_vm0, %v1219_v6  ;;  %1100 = vmatprep.subr.bf16.mxu1 %v1230_v10  ;;  %v1222_v13 = vld [vmem:[%s1420_s16 + $0x18] sm:$0xff]   ;;  %v1223_v14 = vld [vmem:[%s1420_s16 + $0x20] sm:$0xff]   ;;  %v1224_v15 = vld [vmem:[%s1420_s16 + $0x28] sm:$0xff]  }
  0x1a   : > { %v1225_v16 = vld [vmem:[%s1420_s16 + $0x30] sm:$0xff]   ;;  %v1226_v17 = vld [vmem:[%s1420_s16 + $0x38] sm:$0xff]   ;;  %s1307_s16 = smov [#allocation2]  }
  0x1b   : > { %1077 = vmatpush3.bf16.msra.mxu0 %v1218_v5  ;;  %s1247_s18 = sshll.u32 %s1307_s16, 4  ;;  %s1248_s18 = int_to_ptr.vmem [resolvable:$false] %s1247_s18 }
  0x1c   : > { %1101 = vmatpush3.bf16.msra.mxu1 %v1230_v10  ;;  %1126 = vmatprep.subr.bf16.mxu0 %v1235_v20  ;;  %s1249_s19 = scalar_lea.vmem %s1248_s18, 4096  ;;  %p1250_p0 = scmp.lt.s32.totalorder %s1550_s9, %s1248_s18 }
  0x1d   : > { %1102 = vmatprep.subr.bf16.mxu1 %v1231_v11  ;;  %p1251_p1 = scmp.lt.s32.totalorder %s1249_s19, %s1243_s17 }
  0x1e   : > { %1079 = vmatmul.mubr.msk.bf16.vlgmr.msra.gmra.mrb[0].mxu0 %vm376_vm0, %v1220_v8 }
  0x1f   : > { %1082 = vmatprep.mubr.msk.bf16.mxu0 %vm376_vm0, %v1221_v9  ;;  %1127 = vmatpush3.bf16.msra.mxu0 %v1235_v20  ;;  %p1252_p2 = por %p1251_p1, %p1250_p0 }
  0x20   : > { %1103 = vmatpush3.bf16.msra.mxu1 %v1231_v11  ;;  %1128 = vmatprep.subr.bf16.mxu0 %v1236_v21 }
  0x21   : > { %1104 = vmatprep.subr.bf16.mxu1 %v1232_v12  ;;  %p1253_p3 = pnand %p1252_p2, %p1246_p13 }
  0x23   : > { %1129 = vmatpush3.bf16.msra.mxu0 %v1236_v21 }
  0x24   : > { %1105 = vmatpush3.bf16.msra.mxu1 %v1232_v12  ;;  %1130 = vmatprep.subr.bf16.mxu0 %v1237_v22 }
  0x25   : > { %1106 = vmatprep.subr.bf16.mxu1 %v1233_v18 }
  0x26   : > { %1083 = vmatmul.mubr.msk.bf16.gmra.mrb[4].mxu0 %vm376_vm0, %v1222_v13 }
  0x27   : > { %1086 = vmatprep.mubr.msk.bf16.mxu0 %vm376_vm0, %v1223_v14  ;;  %1131 = vmatpush3.bf16.msra.mxu0 %v1237_v22 }
  0x28   : > { %1107 = vmatpush3.bf16.msra.mxu1 %v1233_v18  ;;  %1132 = vmatprep.subr.bf16.mxu0 %v1468_v23 }
  0x29   : > { %1108 = vmatprep.subr.bf16.mxu1 %v1234_v19 }
  0x2b   : > { %1133 = vmatpush3.bf16.msra.mxu0 %v1468_v23 }
  0x2c   : > { %1109 = vmatpush3.bf16.msra.mxu1 %v1234_v19  ;;  %1134 = vmatprep.subr.bf16.mxu0 %v1474_v24  ;;  %v1241_v19 = vld [vmem:[%s1603_s5 + $0x30] sm:$0xff]  }
  0x2d   : > { %1158 = vmatprep.subr.bf16.mxu1 %v1235_v20 }
  0x2e   : > { %1087 = vmatmul.mubr.msk.bf16.gmra.mrb[8].mxu0 %vm376_vm0, %v1224_v15 }
  0x2f   : > { %1090 = vmatprep.mubr.msk.bf16.mxu0 %vm376_vm0, %v1225_v16  ;;  %1135 = vmatpush3.bf16.msra.mxu0 %v1474_v24 }
  0x30   : > { %1136 = vmatprep.subr.bf16.mxu0 %v1481_v25 }
  0x33   : > { %1137 = vmatpush3.bf16.msra.mxu0 %v1481_v25 }
  0x34   : > { %1138 = vmatprep.subr.bf16.mxu0 %v1241_v19 }
  0x36   : > { %1091 = vmatmul.mubr.msk.bf16.gmra.mrb[12].mxu0 %vm376_vm0, %v1226_v17 }
  0x37   : > { %1139 = vmatpush3.bf16.msra.mxu0 %v1241_v19 }
  0xf1   : > { %v1080_v27 = vpop.f32.mrb[0].mxu0 }
  0xf2   : > { %v444_v28 = vadd.f32 %v1080_v27, %v1489_v26  ;;  %v435_v29 = vpop.f32.mrb[1].mxu0 }
  0xf3   : > { %v436_v30 = vadd.f32 %v1489_v26, %v435_v29  ;;  %v1081_v31 = vpop.f32.mrb[2].mxu0 }
  0xf4   : > { %v447_v32 = vadd.f32 %v1081_v31, %v1489_v26  ;;  %v438_v33 = vpop.f32.mrb[3].mxu0  ;;  %v500_v35 = vmax.f32 %v444_v28, 0.0 }
  0xf5   : > { %v439_v34 = vadd.f32 %v1489_v26, %v438_v33  ;;  %v498_v37 = vmax.f32 %v436_v30, 0.0 }
  0xf6   : > { %v501_v36 = vmax.f32 %v447_v32, 0.0 }
  0xf7   : > { %v499_v38 = vmax.f32 %v439_v34, 0.0 }
  0xf8   : > { %v515_v39 = vpack.c.bf16 %v501_v36, %v500_v35 }
  0xf9   : > { %v1084_v40 = vpop.f32.mrb[4].mxu0  ;;  %v514_v41 = vpack.c.bf16 %v499_v38, %v498_v37 }
  0xfa   : > { %v460_v42 = vadd.f32 %v1084_v40, %v1489_v26  ;;  %v451_v43 = vpop.f32.mrb[5].mxu0 }
  0xfb   : > { %v452_v44 = vadd.f32 %v1489_v26, %v451_v43  ;;  %v1085_v45 = vpop.f32.mrb[6].mxu0  ;;  %1110 = vmatprep.mubr.bf16.mxu1 %v514_v41 }
  0xfc   : > { %v463_v46 = vadd.f32 %v1085_v45, %v1489_v26  ;;  %v454_v47 = vpop.f32.mrb[7].mxu0  ;;  %1111 = vmatmul.mubr.bf16.vlgmr.msra.gmra.mrb[0].mxu1 %v515_v39  ;;  %v504_v49 = vmax.f32 %v460_v42, 0.0 }
  0xfd   : > { %v455_v48 = vadd.f32 %v1489_v26, %v454_v47  ;;  %1166 = vmatpush3.bf16.msra.mxu1 %v1235_v20  ;;  %v502_v51 = vmax.f32 %v452_v44, 0.0  ;;  %v1242_v20 = vld [vmem:[%s1603_s5 + $0x38] sm:$0xff]  }
  0xfe   : > { %v505_v50 = vmax.f32 %v463_v46, 0.0  ;;  %1159 = vmatprep.subr.bf16.mxu1 %v1236_v21  ;;  %1140 = vmatprep.subr.bf16.mxu0 %v1242_v20 }
  0xff   : > { %v503_v52 = vmax.f32 %v455_v48, 0.0  ;;  %1141 = vmatpush3.bf16.msra.mxu0 %v1242_v20 }
 0x100   : > { %v517_v53 = vpack.c.bf16 %v505_v50, %v504_v49 }
 0x101   : > { %v516_v54 = vpack.c.bf16 %v503_v52, %v502_v51  ;;  %v1088_v55 = vpop.f32.mrb[8].mxu0  ;;  %1167 = vmatpush3.bf16.msra.mxu1 %v1236_v21  ;;  %v1002_v21 = vld [vmem:[%s1602_s4] ss:$0 sm:$0xff] }
 0x102   : > { %v476_v56 = vadd.f32 %v1088_v55, %v1489_v26  ;;  %v467_v57 = vpop.f32.mrb[9].mxu0  ;;  %1160 = vmatprep.subr.bf16.mxu1 %v1237_v22 }
 0x103   : > { %v468_v58 = vadd.f32 %v1489_v26, %v467_v57  ;;  %v1089_v59 = vpop.f32.mrb[10].mxu0  ;;  %1114 = vmatprep.mubr.bf16.mxu1 %v516_v54 }
 0x104   : > { %v479_v60 = vadd.f32 %v1089_v59, %v1489_v26  ;;  %v470_v61 = vpop.f32.mrb[11].mxu0  ;;  %1115 = vmatmul.mubr.bf16.gmra.mrb[4].mxu1 %v517_v53  ;;  %v508_v63 = vmax.f32 %v476_v56, 0.0 }
 0x105   : > { %v471_v62 = vadd.f32 %v1489_v26, %v470_v61  ;;  %1168 = vmatpush3.bf16.msra.mxu1 %v1237_v22  ;;  %v506_v1 = vmax.f32 %v468_v58, 0.0 }
 0x106   : > { %v509_v0 = vmax.f32 %v479_v60, 0.0  ;;  %1161 = vmatprep.subr.bf16.mxu1 %v1468_v23 }
 0x107   : > { %v507_v2 = vmax.f32 %v471_v62, 0.0 }
 0x108   : > { %v519_v3 = vpack.c.bf16 %v509_v0, %v508_v63 }
 0x109   : > { %v518_v4 = vpack.c.bf16 %v507_v2, %v506_v1  ;;  %v1092_v5 = vpop.f32.mrb[12].mxu0  ;;  %1169 = vmatpush3.bf16.msra.mxu1 %v1468_v23 }
 0x10a   : > { %v492_v6 = vadd.f32 %v1092_v5, %v1489_v26  ;;  %v483_v7 = vpop.f32.mrb[13].mxu0  ;;  %1162 = vmatprep.subr.bf16.mxu1 %v1474_v24 }
 0x10b   : > { %v484_v8 = vadd.f32 %v1489_v26, %v483_v7  ;;  %v1093_v9 = vpop.f32.mrb[14].mxu0  ;;  %1118 = vmatprep.mubr.bf16.mxu1 %v518_v4 }
 0x10c   : > { %v495_v10 = vadd.f32 %v1093_v9, %v1489_v26  ;;  %v486_v11 = vpop.f32.mrb[15].mxu0  ;;  %1119 = vmatmul.mubr.bf16.gmra.mrb[8].mxu1 %v519_v3  ;;  %v512_v13 = vmax.f32 %v492_v6, 0.0 }
 0x10d   : > { %v487_v12 = vadd.f32 %v1489_v26, %v486_v11  ;;  %1170 = vmatpush3.bf16.msra.mxu1 %v1474_v24  ;;  %v510_v15 = vmax.f32 %v484_v8, 0.0 }
 0x10e   : > { %v513_v14 = vmax.f32 %v495_v10, 0.0  ;;  %1163 = vmatprep.subr.bf16.mxu1 %v1481_v25 }
 0x10f   : > { %v511_v16 = vmax.f32 %v487_v12, 0.0 }
 0x110   : > { %v521_v17 = vpack.c.bf16 %v513_v14, %v512_v13  ;;  %v1011_v14 = vld [vmem:[%s1604_s6] ss:$0 sm:$0xff] }
 0x111   : > { %v520_v18 = vpack.c.bf16 %v511_v16, %v510_v15  ;;  %1171 = vmatpush3.bf16.msra.mxu1 %v1481_v25 }
 0x112   : > { %1164 = vmatprep.subr.bf16.mxu1 %v1241_v19 }
 0x113   : > { %1122 = vmatprep.mubr.bf16.mxu1 %v520_v18 }
 0x114   : > { %1123 = vmatmul.mubr.bf16.gmra.mrb[12].mxu1 %v521_v17 }
 0x115   : > { %1172 = vmatpush3.bf16.msra.mxu1 %v1241_v19 }
 0x116   : > { %1165 = vmatprep.subr.bf16.mxu1 %v1242_v20 }
 0x119   : > { %1173 = vmatpush3.bf16.msra.mxu1 %v1242_v20 }
 0x1cf   : > { %v1112_v22 = vpop.f32.mrb[0].mxu1 }
 0x1d0   : > { %v636_v23 = vadd.f32 %v1112_v22, %v1002_v21  ;;  %v627_v24 = vpop.f32.mrb[1].mxu1 }
 0x1d1   : > { %v628_v25 = vadd.f32 %v1002_v21, %v627_v24  ;;  %v1113_v26 = vpop.f32.mrb[2].mxu1 }
 0x1d2   : > { %v639_v27 = vadd.f32 %v1113_v26, %v1002_v21  ;;  %v630_v28 = vpop.f32.mrb[3].mxu1  ;;  %v692_v30 = vmax.f32 %v636_v23, 0.0 }
 0x1d3   : > { %v631_v29 = vadd.f32 %v1002_v21, %v630_v28  ;;  %v690_v32 = vmax.f32 %v628_v25, 0.0 }
 0x1d4   : > { %v693_v31 = vmax.f32 %v639_v27, 0.0 }
 0x1d5   : > { %v691_v33 = vmax.f32 %v631_v29, 0.0 }
 0x1d6   : > { %v707_v34 = vpack.c.bf16 %v693_v31, %v692_v30 }
 0x1d7   : > { %v706_v35 = vpack.c.bf16 %v691_v33, %v690_v32  ;;  %v1116_v36 = vpop.f32.mrb[4].mxu1 }
 0x1d8   : > { %v652_v37 = vadd.f32 %v1116_v36, %v1002_v21  ;;  %v643_v38 = vpop.f32.mrb[5].mxu1 }
 0x1d9   : > { %v644_v39 = vadd.f32 %v1002_v21, %v643_v38  ;;  %v1117_v40 = vpop.f32.mrb[6].mxu1  ;;  %1142 = vmatprep.mubr.bf16.mxu0 %v706_v35 }
 0x1da   : > { %v655_v41 = vadd.f32 %v1117_v40, %v1002_v21  ;;  %v646_v42 = vpop.f32.mrb[7].mxu1  ;;  %1143 = vmatmul.mubr.bf16.vlgmr.msra.gmra.mrb[16].mxu0 %v707_v34  ;;  %v696_v44 = vmax.f32 %v652_v37, 0.0 }
 0x1db   : > { %v647_v43 = vadd.f32 %v1002_v21, %v646_v42  ;;  %v694_v46 = vmax.f32 %v644_v39, 0.0 }
 0x1dc   : > { %v697_v45 = vmax.f32 %v655_v41, 0.0 }
 0x1dd   : > { %v695_v47 = vmax.f32 %v647_v43, 0.0 }
 0x1de   : > { %v709_v48 = vpack.c.bf16 %v697_v45, %v696_v44 }
 0x1df   : > { %v708_v49 = vpack.c.bf16 %v695_v47, %v694_v46  ;;  %v1120_v50 = vpop.f32.mrb[8].mxu1 }
 0x1e0   : > { %v668_v51 = vadd.f32 %v1120_v50, %v1002_v21  ;;  %v659_v52 = vpop.f32.mrb[9].mxu1 }
 0x1e1   : > { %v660_v53 = vadd.f32 %v1002_v21, %v659_v52  ;;  %v1121_v54 = vpop.f32.mrb[10].mxu1  ;;  %1146 = vmatprep.mubr.bf16.mxu0 %v708_v49 }
 0x1e2   : > { %v671_v55 = vadd.f32 %v1121_v54, %v1002_v21  ;;  %v662_v56 = vpop.f32.mrb[11].mxu1  ;;  %1147 = vmatmul.mubr.bf16.gmra.mrb[20].mxu0 %v709_v48  ;;  %v700_v58 = vmax.f32 %v668_v51, 0.0 }
 0x1e3   : > { %v663_v57 = vadd.f32 %v1002_v21, %v662_v56  ;;  %v698_v60 = vmax.f32 %v660_v53, 0.0 }
 0x1e4   : > { %v701_v59 = vmax.f32 %v671_v55, 0.0 }
 0x1e5   : > { %v699_v61 = vmax.f32 %v663_v57, 0.0 }
 0x1e6   : > { %v711_v62 = vpack.c.bf16 %v701_v59, %v700_v58 }
 0x1e7   : > { %v710_v63 = vpack.c.bf16 %v699_v61, %v698_v60  ;;  %v1124_v0 = vpop.f32.mrb[12].mxu1 }
 0x1e8   : > { %v684_v1 = vadd.f32 %v1124_v0, %v1002_v21  ;;  %v675_v2 = vpop.f32.mrb[13].mxu1 }
 0x1e9   : > { %v676_v3 = vadd.f32 %v1002_v21, %v675_v2  ;;  %v1125_v4 = vpop.f32.mrb[14].mxu1  ;;  %1150 = vmatprep.mubr.bf16.mxu0 %v710_v63 }
 0x1ea   : > { %v687_v5 = vadd.f32 %v1125_v4, %v1002_v21  ;;  %v678_v6 = vpop.f32.mrb[15].mxu1  ;;  %1151 = vmatmul.mubr.bf16.gmra.mrb[24].mxu0 %v711_v62  ;;  %v704_v8 = vmax.f32 %v684_v1, 0.0 }
 0x1eb   : > { %v679_v7 = vadd.f32 %v1002_v21, %v678_v6  ;;  %v702_v10 = vmax.f32 %v676_v3, 0.0 }
 0x1ec   : > { %v705_v9 = vmax.f32 %v687_v5, 0.0 }
 0x1ed   : > { %v703_v11 = vmax.f32 %v679_v7, 0.0 }
 0x1ee   : > { %v713_v12 = vpack.c.bf16 %v705_v9, %v704_v8 }
 0x1ef   : > { %v712_v13 = vpack.c.bf16 %v703_v11, %v702_v10 }
 0x1f1   : > { %1154 = vmatprep.mubr.bf16.mxu1 %v712_v13 }
 0x1f2   : > { %1155 = vmatmul.mubr.bf16.vlgmr.msra.gmra.mrb[16].mxu1 %v713_v12 }
 0x2ad   : > { %v1144_v15 = vpop.f32.mrb[16].mxu0 }
 0x2ae   : > { %v828_v16 = vadd.f32 %v1144_v15, %v1011_v14  ;;  %v819_v17 = vpop.f32.mrb[17].mxu0 }
 0x2af   : > { %v820_v18 = vadd.f32 %v1011_v14, %v819_v17  ;;  %v1145_v19 = vpop.f32.mrb[18].mxu0 }
 0x2b0   : > { %884 = vst [vmem:[%s1528_s29 + $0x10] sm:$0xff] %v828_v16  ;;  %v831_v20 = vadd.f32 %v1145_v19, %v1011_v14  ;;  %v822_v21 = vpop.f32.mrb[19].mxu0 }
 0x2b1   : > { %882 = vst [vmem:[%s1528_s29] sm:$0xff] %v820_v18  ;;  %v823_v22 = vadd.f32 %v1011_v14, %v822_v21 }
 0x2b2   : > { %885 = vst [vmem:[%s1528_s29 + $0x18] sm:$0xff] %v831_v20 }
 0x2b3   : > { %883 = vst [vmem:[%s1528_s29 + $0x8] sm:$0xff] %v823_v22 }
 0x2b5   : > { %v1148_v23 = vpop.f32.mrb[20].mxu0 }
 0x2b6   : > { %v844_v24 = vadd.f32 %v1148_v23, %v1011_v14  ;;  %v835_v25 = vpop.f32.mrb[21].mxu0 }
 0x2b7   : > { %v836_v26 = vadd.f32 %v1011_v14, %v835_v25  ;;  %v1149_v27 = vpop.f32.mrb[22].mxu0 }
 0x2b8   : > { %888 = vst [vmem:[%s1528_s29 + $0x30] sm:$0xff] %v844_v24  ;;  %v847_v28 = vadd.f32 %v1149_v27, %v1011_v14  ;;  %v838_v29 = vpop.f32.mrb[23].mxu0 }
 0x2b9   : > { %886 = vst [vmem:[%s1528_s29 + $0x20] sm:$0xff] %v836_v26  ;;  %v839_v30 = vadd.f32 %v1011_v14, %v838_v29 }
 0x2ba   : > { %889 = vst [vmem:[%s1528_s29 + $0x38] sm:$0xff] %v847_v28 }
 0x2bb   : > { %887 = vst [vmem:[%s1528_s29 + $0x28] sm:$0xff] %v839_v30 }
 0x2bd   : > { %v1152_v31 = vpop.f32.mrb[24].mxu0 }
 0x2be   : > { %v860_v32 = vadd.f32 %v1152_v31, %v1011_v14  ;;  %v851_v33 = vpop.f32.mrb[25].mxu0 }
 0x2bf   : > { %v852_v34 = vadd.f32 %v1011_v14, %v851_v33  ;;  %v1153_v35 = vpop.f32.mrb[26].mxu0 }
 0x2c0   : > { %892 = vst [vmem:[%s1528_s29 + $0x50] sm:$0xff] %v860_v32  ;;  %v863_v36 = vadd.f32 %v1153_v35, %v1011_v14  ;;  %v854_v37 = vpop.f32.mrb[27].mxu0 }
 0x2c1   : > { %890 = vst [vmem:[%s1528_s29 + $0x40] sm:$0xff] %v852_v34  ;;  %v855_v38 = vadd.f32 %v1011_v14, %v854_v37 }
 0x2c2   : > { %893 = vst [vmem:[%s1528_s29 + $0x58] sm:$0xff] %v863_v36 }
 0x2c3   : > { %891 = vst [vmem:[%s1528_s29 + $0x48] sm:$0xff] %v855_v38 }
 0x2c5   : > { %v1156_v39 = vpop.f32.mrb[16].mxu1 }
 0x2c6   : > { %v876_v40 = vadd.f32 %v1156_v39, %v1011_v14  ;;  %v867_v41 = vpop.f32.mrb[17].mxu1 }
 0x2c7   : > { %v868_v42 = vadd.f32 %v1011_v14, %v867_v41  ;;  %v1157_v43 = vpop.f32.mrb[18].mxu1 }
 0x2c8   : > { %896 = vst [vmem:[%s1528_s29 + $0x70] sm:$0xff] %v876_v40  ;;  %v879_v44 = vadd.f32 %v1157_v43, %v1011_v14  ;;  %v870_v45 = vpop.f32.mrb[19].mxu1 }
 0x2c9   : > { %894 = vst [vmem:[%s1528_s29 + $0x60] sm:$0xff] %v868_v42  ;;  %v871_v46 = vadd.f32 %v1011_v14, %v870_v45 }
 0x2ca   : > { %897 = vst [vmem:[%s1528_s29 + $0x78] sm:$0xff] %v879_v44 }
 0x2cb   : > { %895 = vst [vmem:[%s1528_s29 + $0x68] sm:$0xff] %v871_v46 }
 0x2cc   : > { %1256 = shalt.err (!%p1253_p3)
}
 0x2cd   : > { %s1257_s20 = scalar_lea.hbm %s1548_s15, 2048  ;;  %s1261_s23 = scalar_lea.hbm %s1605_s7, 4096 }
 0x2ce   : > { %p1258_p4 = scmp.ne.s32.totalorder %s1548_s15, %s1257_s20  ;;  %p1262_p9 = scmp.lt.u32.totalorder %s1548_s15, %s1605_s7 }
 0x2cf   : > { %p1263_p10 = scmp.lt.u32.totalorder %s1261_s23, %s1257_s20  ;;  %p1265_p12 = scmp.lt.u32.totalorder %s1257_s20, %s1548_s15 }
 0x2d0   : > { %p1259_p7 = pnand %p1258_p4, %p1388_p5 }
 0x2d1   : > { %p1264_p11 = por %p1263_p10, %p1262_p9 }
 0x2d2   : > { %p1260_p8 = pneg %p1259_p7 }
 0x2d3   : > { %p1266_p13 = por %p1265_p12, %p1264_p11 }
 0x2d5   : > { %p1267_p0 = pnand %p1266_p13, %p1260_p8 }
 0x2d7   : > { %1270 = shalt.err (!%p1267_p0)
}
 0x2d8   : > { %s1308_s13 = smov 128   ;;  %s1309_s14 = smov 8  }
 0x2d9   : > { %1174 = dma.vmem_to_hbm [thread:$0]  (%p1388_p5), %s1550_s9, 2048, %s1548_s15, %s1557_s28, %s1308_s13, %s1308_s13, %s1309_s14  }
 0x2da PF: > { %p1180_p1 = scmp.ge.s32.totalorder %s1305_s27, 2  ;;  %s927_s17 = sand.u32 1, %s1293_s24  }
 0x2db   : > { %s928_s16 = scalar_lea.sflag [#allocation3], %s927_s17 }
 0x2dc   : > { %p1177_p2 = pnand %p1180_p1, %p1392_p6 }
 0x2de   : > { %1288 = dma.done.wait (!%p1177_p2), %s928_s16, 2048  }
 0x2df   : > { %1290 = vsyncadd (!%p1177_p2), %s928_s16, 4294965248  ;;  %p17_p3 = scmp.ge.s32.totalorder %s1375_s30, 4   ;;  %s1608_s24 = smov %s1297_s25 }
 0x2e0   : > { %s1609_s25 = smov %s1301_s26  ;;  %s1610_s26 = smov %s1386_s10 }
 0x2e1   : > { %s1611_s27 = smov %s1375_s30  ;;  %19 = sbr.rel (!%p17_p3) target bundleno = 3 (0x3), region = 83 }
 0x2e8   :  { %933 = vsyncpa [#allocation3], 1 }
 0x2e9   :  { %935 = vsyncpa [#allocation3 + $0x1], 1 }

</bundles_post_ra>
